<compile_context>
chip_gen: v6e
topology: v6e:2x2x1
jax: 0.10.0
libtpu: 0.0.40
codegen_flags: <defaults>
</compile_context>

<pallas_src>
import math

import jax
import jax.numpy as jnp
from jax.experimental import pallas as pl
from jax.experimental.pallas import tpu as pltpu


# ----------------------------------------------------------------------------
# Pallas fused matmul kernel:  C = epilogue(A @ B * scale + shift)
#   A: (M, K) bf16, B: (K, N) bf16, scale/shift: (1, N) f32 broadcast over rows.
# ----------------------------------------------------------------------------
def _make_matmul_kernel(mode: str, negative_slope: float = 0.1):
    def kernel(a_ref, b_ref, scale_ref, shift_ref, o_ref, acc_ref):
        @pl.when(pl.program_id(2) == 0)
        def _():
            acc_ref[...] = jnp.zeros_like(acc_ref)

        acc_ref[...] += jnp.dot(
            a_ref[...], b_ref[...], preferred_element_type=jnp.float32
        )

        @pl.when(pl.program_id(2) == pl.num_programs(2) - 1)
        def _():
            y = acc_ref[...] * scale_ref[...] + shift_ref[...]
            if mode == "leaky":
                y = jnp.where(y > 0, y, negative_slope * y)
            elif mode == "sigmoid":
                y = jax.nn.sigmoid(y)
            # mode == "linear": no activation
            o_ref[...] = y.astype(o_ref.dtype)

    return kernel


def _round_up(x: int, m: int) -> int:
    return ((x + m - 1) // m) * m


def matmul_fused(a, b_packed, scale, shift, mode, *, tm, tn, tk, out_dtype):
    """a: (M,K) bf16, b_packed: (Kp,N) bf16 (pre-padded), scale/shift: (1,N) f32."""
    M, K = a.shape
    Kp, N = b_packed.shape
    Mp = _round_up(M, tm)

    if Mp != M or Kp != K:
        a = jnp.pad(a, ((0, Mp - M), (0, Kp - K)))

    grid = (Mp // tm, N // tn, Kp // tk)

    out = pl.pallas_call(
        _make_matmul_kernel(mode),
        out_shape=jax.ShapeDtypeStruct((Mp, N), out_dtype),
        grid_spec=pltpu.PrefetchScalarGridSpec(
            num_scalar_prefetch=0,
            grid=grid,
            in_specs=[
                pl.BlockSpec((tm, tk), lambda i, j, k: (i, k)),
                pl.BlockSpec((tk, tn), lambda i, j, k: (k, j)),
                pl.BlockSpec((1, tn), lambda i, j, k: (0, j)),
                pl.BlockSpec((1, tn), lambda i, j, k: (0, j)),
            ],
            out_specs=pl.BlockSpec((tm, tn), lambda i, j, k: (i, j)),
            scratch_shapes=[pltpu.VMEM((tm, tn), jnp.float32)],
        ),
        compiler_params=pltpu.CompilerParams(
            dimension_semantics=("parallel", "parallel", "arbitrary"),
            vmem_limit_bytes=32 * 1024 * 1024,
        ),
    )(a, b_packed, scale, shift)

    if Mp != M:
        out = out[:M]
    return out


# ----------------------------------------------------------------------------
# Conv2d = im2col (glue) + Pallas fused matmul
# ----------------------------------------------------------------------------
def _im2col(x_nhwc, kh, kw, stride, pad):
    x = x_nhwc
    if pad:
        x = jnp.pad(x, ((0, 0), (pad, pad), (pad, pad), (0, 0)))
    B, Hp, Wp, C = x.shape
    oh = (Hp - kh) // stride + 1
    ow = (Wp - kw) // stride + 1
    cols = []
    for i in range(kh):
        for j in range(kw):
            cols.append(
                x[:, i : i + stride * oh : stride, j : j + stride * ow : stride, :]
            )
    p = jnp.stack(cols, axis=3)                      # (B, oh, ow, kh*kw, C)
    return p.reshape(B * oh * ow, kh * kw * C), oh, ow


def conv2d_pallas(x_nhwc, layer, *, stride, pad, mode, out_dtype=jnp.bfloat16):
    kh, kw = layer["kh"], layer["kw"]
    B = x_nhwc.shape[0]
    if kh == 1 and kw == 1 and stride == 1 and pad == 0:
        _, H, W, C = x_nhwc.shape
        patches, oh, ow = x_nhwc.reshape(B * H * W, C), H, W
    else:
        patches, oh, ow = _im2col(x_nhwc, kh, kw, stride, pad)

    M = patches.shape[0]
    tm = min(256, _round_up(M, 16))    # small tm for tiny-M (late / 1x1) layers

    y = matmul_fused(
        patches.astype(jnp.bfloat16), layer["w"], layer["scale"], layer["shift"],
        mode, tm=tm, tn=layer["tn"], tk=layer["tk"], out_dtype=out_dtype,
    )
    N = layer["w"].shape[1]
    return y.reshape(B, oh, ow, N)


# ----------------------------------------------------------------------------
# Parameter construction + one-time weight packing
# ----------------------------------------------------------------------------
def _conv_params(key, cout, cin, kh, kw):
    kw_, kb_ = jax.random.split(key)
    fan_in = cin * kh * kw
    w = jax.random.normal(kw_, (cout, cin, kh, kw), jnp.float32) / math.sqrt(fan_in)
    b = 0.01 * jax.random.normal(kb_, (cout,), jnp.float32)
    return w, b


def _bn_params(key, c):
    k1, k2, k3, k4 = jax.random.split(key, 4)
    gamma = 1.0 + 0.1 * jax.random.normal(k1, (c,), jnp.float32)
    beta = 0.1 * jax.random.normal(k2, (c,), jnp.float32)
    mean = 0.1 * jax.random.normal(k3, (c,), jnp.float32)
    var = jax.random.uniform(k4, (c,), jnp.float32, minval=0.5, maxval=1.5)
    return gamma, beta, mean, var


def _pick_kn_tiles(K, N):
    tn = N if N <= 512 else 512
    # Full-K block if the bf16 B tile stays <= ~6 MB (so 2x buffering fits VMEM easily),
    # otherwise chunk the reduction at 2048.
    if K * tn * 2 <= 6 * 1024 * 1024:
        tk = K
    else:
        tk = 2048
    return tk, tn


def _pack_layer(w_oihw, bias, bn=None, eps=1e-5):
    """Fold BN into per-channel scale/shift, reshape weight to (K,N), cast bf16, pad K."""
    cout, cin, kh, kw = w_oihw.shape
    if bn is not None:
        gamma, beta, mean, var = bn
        scale = gamma / jnp.sqrt(var + eps)
        shift = (bias - mean) * scale + beta
    else:
        scale = jnp.ones((cout,), jnp.float32)
        shift = bias

    K, N = kh * kw * cin, cout
    tk, tn = _pick_kn_tiles(K, N)
    Kp = _round_up(K, tk)

    w2d = jnp.transpose(w_oihw, (2, 3, 1, 0)).reshape(K, N)
    if Kp != K:
        w2d = jnp.pad(w2d, ((0, Kp - K), (0, 0)))

    return dict(
        w=w2d.astype(jnp.bfloat16),
        scale=scale.reshape(1, N).astype(jnp.float32),
        shift=shift.reshape(1, N).astype(jnp.float32),
        tk=tk, tn=tn, kh=kh, kw=kw,
    )


def build_discriminator_params(key, embed_size):
    # x_layer conv configs: (cout, cin, k, stride, pad, has_bn)
    x_cfg = [
        (64, 3, 3, 2, 1, False),
        (128, 64, 3, 2, 1, True),
        (256, 128, 3, 2, 1, True),
        (512, 256, 3, 2, 1, True),
        (1024, 512, 3, 2, 1, True),
        (2048, 1024, 5, 2, 1, True),
        (2048, 2048, 3, 1, 0, False),
    ]
    keys = jax.random.split(key, len(x_cfg) + 3)
    x_layers = []
    for idx, (cout, cin, k, s, p, has_bn) in enumerate(x_cfg):
        kc, kb = jax.random.split(keys[idx])
        w, b = _conv_params(kc, cout, cin, k, k)
        bn = _bn_params(kb, cout) if has_bn else None
        layer = _pack_layer(w, b, bn)
        layer["stride"], layer["pad"] = s, p
        x_layers.append(layer)
    params = {"x_layers": x_layers}

    wz, bz = _conv_params(keys[-3], 2048, embed_size, 1, 1)
    params["z"] = _pack_layer(wz, bz)

    w1, b1 = _conv_params(keys[-2], 4096, 4096, 1, 1)
    params["last1"] = _pack_layer(w1, b1)

    w2, b2 = _conv_params(keys[-1], 1, 4096, 1, 1)
    params["last2"] = _pack_layer(w2, b2)
    return params


# ----------------------------------------------------------------------------
# Forward pass (matches Discriminator.forward semantics, inference mode)
# ----------------------------------------------------------------------------
def discriminator_forward(params, x_nchw, z_nchw):
    # NCHW -> NHWC, bf16 activations
    x = jnp.transpose(x_nchw, (0, 2, 3, 1)).astype(jnp.bfloat16)
    z = jnp.transpose(z_nchw, (0, 2, 3, 1)).astype(jnp.bfloat16)

    # x_layer: 6 conv(+BN)+LeakyReLU blocks, then a linear conv.
    out = x
    layers = params["x_layers"]
    for li, layer in enumerate(layers):
        mode = "linear" if li == len(layers) - 1 else "leaky"
        out = conv2d_pallas(out, layer, stride=layer["stride"], pad=layer["pad"],
                            mode=mode)
    output_x = out  # (B, 1, 1, 2048)

    # z_layer: 1x1 conv + LeakyReLU
    output_z = conv2d_pallas(z, params["z"], stride=1, pad=0, mode="leaky")

    # channel concat (NHWC -> last axis, equivalent to torch.cat dim=1)
    concat_x_z = jnp.concatenate([output_x, output_z], axis=-1)  # (B, 1, 1, 4096)

    # last1: 1x1 conv + LeakyReLU  (f32 output -> feature)
    out1 = conv2d_pallas(concat_x_z, params["last1"], stride=1, pad=0, mode="leaky",
                         out_dtype=jnp.float32)                  # (B, 1, 1, 4096)

    feature = out1.reshape(out1.shape[0], -1)

    # last2: 1x1 conv -> sigmoid
    out2 = conv2d_pallas(out1, params["last2"], stride=1, pad=0, mode="sigmoid",
                         out_dtype=jnp.float32)                  # (B, 1, 1, 1)

    return jnp.squeeze(out2), feature


# ----------------------------------------------------------------------------
if __name__ == "__main__":
    EMBED_SIZE = 64
    B = 2
    H = W = 224  # conv stack reduces 224x224 -> 1x1, as required for the channel concat

    key = jax.random.PRNGKey(0)
    kx, kz, kp = jax.random.split(key, 3)

    x = jax.random.normal(kx, (B, 3, H, W), jnp.float32)           # NCHW like PyTorch
    z = jax.random.normal(kz, (B, EMBED_SIZE, 1, 1), jnp.float32)  # NCHW like PyTorch

    params = build_discriminator_params(kp, EMBED_SIZE)

    score, feature = discriminator_forward(params, x, z)
    score = jax.block_until_ready(score)
    feature = jax.block_until_ready(feature)

    assert score.shape == (B,)
    assert feature.shape == (B, 4096)
    assert bool(jnp.all(jnp.isfinite(score)))
    assert bool(jnp.all(jnp.isfinite(feature)))
    print("KERNEL_OK")
</pallas_src>

<mosaic_0001>
module attributes {stable_mosaic.version = 11 : i64} {
  func.func @kernel(%arg0: i32, %arg1: i32, %arg2: i32, %arg3: memref<256x27xbf16, #tpu.memory_space<vmem>>, %arg4: memref<27x64xbf16, #tpu.memory_space<vmem>>, %arg5: memref<1x64xf32, #tpu.memory_space<vmem>>, %arg6: memref<1x64xf32, #tpu.memory_space<vmem>>, %arg7: memref<256x64xbf16, #tpu.memory_space<vmem>>, %arg8: memref<256x64xf32, #tpu.memory_space<vmem>>) attributes {dimension_semantics = [#tpu.dimension_semantics<parallel>, #tpu.dimension_semantics<parallel>, #tpu.dimension_semantics<arbitrary>], iteration_bounds = array<i64: 98, 1, 1>, scalar_prefetch = 0 : i64, scratch_operands = 1 : i64, tpu.core_type = #tpu.core_type<tc>, window_params = [{transform_indices = @transform_0, window_bounds = array<i64: 256, 27>}, {transform_indices = @transform_1, window_bounds = array<i64: 27, 64>}, {transform_indices = @transform_2, window_bounds = array<i64: 1, 64>}, {transform_indices = @transform_3, window_bounds = array<i64: 1, 64>}, {transform_indices = @transform_4, window_bounds = array<i64: 256, 64>}]} {
    %c0_i32 = arith.constant 0 : i32
    %0 = arith.cmpi eq, %arg2, %c0_i32 : i32
    %1 = arith.extui %0 : i1 to i32
    %c0_i32_0 = arith.constant 0 : i32
    %2 = arith.cmpi ne, %1, %c0_i32_0 : i32
    scf.if %2 {
      %cst_10 = arith.constant 0.000000e+00 : f32
      %12 = vector.broadcast %cst_10 : f32 to vector<256x64xf32>
      %c0_11 = arith.constant 0 : index
      %c0_12 = arith.constant 0 : index
      %13 = vector.load %arg8[%c0_11, %c0_12] : memref<256x64xf32, #tpu.memory_space<vmem>>, vector<256x64xf32>
      tpu.vector_store %arg8[%c0_11, %c0_12], %12 {strides = array<i32>} : memref<256x64xf32, #tpu.memory_space<vmem>>, vector<256x64xf32>,
    } else {
    }
    %c0 = arith.constant 0 : index
    %c0_1 = arith.constant 0 : index
    %3 = vector.load %arg8[%c0, %c0_1] : memref<256x64xf32, #tpu.memory_space<vmem>>, vector<256x64xf32>
    %c0_2 = arith.constant 0 : index
    %c0_3 = arith.constant 0 : index
    %4 = vector.load %arg3[%c0_2, %c0_3] : memref<256x27xbf16, #tpu.memory_space<vmem>>, vector<256x27xbf16>
    %c0_4 = arith.constant 0 : index
    %c0_5 = arith.constant 0 : index
    %5 = vector.load %arg4[%c0_4, %c0_5] : memref<27x64xbf16, #tpu.memory_space<vmem>>, vector<27x64xbf16>
    %cst = arith.constant dense<0.000000e+00> : vector<256x64xf32>
    %6 = tpu.matmul %4, %5, %cst {dimension_numbers = #tpu.dot_dimension_numbers<[1], [0], [0], [1], [0, 0, 1, 1], [], []>} : vector<256x27xbf16>, vector<27x64xbf16>, vector<256x64xf32> -> vector<256x64xf32>
    %7 = arith.addf %3, %6 : vector<256x64xf32>
    %c0_6 = arith.constant 0 : index
    %c0_7 = arith.constant 0 : index
    %8 = vector.load %arg8[%c0_6, %c0_7] : memref<256x64xf32, #tpu.memory_space<vmem>>, vector<256x64xf32>
    tpu.vector_store %arg8[%c0_6, %c0_7], %7 {strides = array<i32>} : memref<256x64xf32, #tpu.memory_space<vmem>>, vector<256x64xf32>,
    %c0_i32_8 = arith.constant 0 : i32
    %9 = arith.cmpi eq, %arg2, %c0_i32_8 : i32
    %10 = arith.extui %9 : i1 to i32
    %c0_i32_9 = arith.constant 0 : i32
    %11 = arith.cmpi ne, %10, %c0_i32_9 : i32
    scf.if %11 {
      %c0_10 = arith.constant 0 : index
      %c0_11 = arith.constant 0 : index
      %12 = vector.load %arg8[%c0_10, %c0_11] : memref<256x64xf32, #tpu.memory_space<vmem>>, vector<256x64xf32>
      %c0_12 = arith.constant 0 : index
      %c0_13 = arith.constant 0 : index
      %13 = vector.load %arg5[%c0_12, %c0_13] : memref<1x64xf32, #tpu.memory_space<vmem>>, vector<1x64xf32>
      %14 = vector.broadcast %13 : vector<1x64xf32> to vector<256x64xf32>
      %15 = arith.mulf %12, %14 : vector<256x64xf32>
      %c0_14 = arith.constant 0 : index
      %c0_15 = arith.constant 0 : index
      %16 = vector.load %arg6[%c0_14, %c0_15] : memref<1x64xf32, #tpu.memory_space<vmem>>, vector<1x64xf32>
      %17 = vector.broadcast %16 : vector<1x64xf32> to vector<256x64xf32>
      %18 = arith.addf %15, %17 : vector<256x64xf32>
      %cst_16 = arith.constant 0.000000e+00 : f32
      %19 = vector.broadcast %cst_16 : f32 to vector<256x64xf32>
      %20 = arith.cmpf ogt, %18, %19 : vector<256x64xf32>
      %cst_17 = arith.constant 1.000000e-01 : f32
      %21 = vector.broadcast %cst_17 : f32 to vector<256x64xf32>
      %22 = arith.mulf %21, %18 : vector<256x64xf32>
      %23 = arith.select %20, %18, %22 : vector<256x64xi1>, vector<256x64xf32>
      %24 = arith.truncf %23 : vector<256x64xf32> to vector<256x64xbf16>
      %c0_18 = arith.constant 0 : index
      %c0_19 = arith.constant 0 : index
      %25 = vector.load %arg7[%c0_18, %c0_19] : memref<256x64xbf16, #tpu.memory_space<vmem>>, vector<256x64xbf16>
      tpu.vector_store %arg7[%c0_18, %c0_19], %24 {strides = array<i32>} : memref<256x64xbf16, #tpu.memory_space<vmem>>, vector<256x64xbf16>,
    } else {
    }
    return
  }
  func.func @transform_0(%arg0: i32, %arg1: i32, %arg2: i32) -> (i32, i32) {
    %c0_i32 = arith.constant 0 : i32
    return %arg0, %arg2 : i32, i32
  }
  func.func @transform_1(%arg0: i32, %arg1: i32, %arg2: i32) -> (i32, i32) {
    %c0_i32 = arith.constant 0 : i32
    return %arg2, %arg1 : i32, i32
  }
  func.func @transform_2(%arg0: i32, %arg1: i32, %arg2: i32) -> (i32, i32) {
    %c0_i32 = arith.constant 0 : i32
    %c0_i32_0 = arith.constant 0 : i32
    return %c0_i32, %arg1 : i32, i32
  }
  func.func @transform_3(%arg0: i32, %arg1: i32, %arg2: i32) -> (i32, i32) {
    %c0_i32 = arith.constant 0 : i32
    %c0_i32_0 = arith.constant 0 : i32
    return %c0_i32, %arg1 : i32, i32
  }
  func.func @transform_4(%arg0: i32, %arg1: i32, %arg2: i32) -> (i32, i32) {
    %c0_i32 = arith.constant 0 : i32
    return %arg0, %arg1 : i32, i32
  }
}

</mosaic_0001>

<bundles_post_ra>
// kernel: tpu_custom_call.1
= control target key start
LH: loop header
LB: loop body
LE: loop exit
PB: predicated region body
PF: predicated region fallthrough
CT: control target
= control target key end

     0   :  { %s1539_s15 = smov 0   ;;  %s1541_s16 = smov 0   ;;  %s1882_s0 = inlined_call_operand.vmem [shape: bf16[25088,27], index: 0, kind: input, shape index: {}]   ;;  %s1883_s1 = inlined_call_operand.vmem [shape: bf16[27,64], index: 1, kind: input, shape index: {}]   ;;  %s1884_s2 = inlined_call_operand.vmem [shape: f32[1,64], index: 2, kind: input, shape index: {}]   ;;  %s1885_s3 = inlined_call_operand.vmem [shape: f32[1,64], index: 3, kind: input, shape index: {}]   ;;  %s1886_s4 = inlined_call_operand.vmem [shape: bf16[25088,64], index: 4, kind: output, shape index: {}]  }
   0x1   :  { %s1543_s17 = smov 0  }
   0x2 LB: > { %s33_s18 = sadd.s32 1, %s1506_s16  ;;  %p1279_p0 = scmp.ge.s32.totalorder %s1510_s17, 1  ;;  %s1510_s17 = sphi %s1543_s17, %s14_s17   ;;  %s1506_s16 = sphi %s1541_s16, %s1889_s16   ;;  %s1502_s15 = sphi %s1539_s15, %s1888_s15  }
   0x3   : > { %p35_p1 = scmp.ge.s32.totalorder %s33_s18, 98  ;;  %p221_p2 = scmp.lt.s32.totalorder %s1510_s17, 99 }
   0x5   : > { %s1891_s18 = smov (%p35_p1, %s33_s18), 0  ;;  %p222_p3 = pnand %p1279_p0, %p221_p2 }
   0x6   : > { %s1280_s21 = sshll.u32 (!%p222_p3), %s1502_s15, 5 }
   0x7   : > { %225 = sbr.rel (%p222_p3) target bundleno = 291 (0x123), region = 36  ;;  %p1565_p4 = scmp.lt.s32.totalorder (!%p222_p3), %s1280_s21, 3135 }
   0xc   : > { %v1470_v0 = vld [vmem:[%s1883_s1 + $0x8] sm:$0x3f]   ;;  %vm546_vm0 = vcmask 1044480   ;;  %vm547_vm1 = vcmask 1045504   ;;  %v1512_v1 = vmov 65535   ;;  %vm305_vm2 = vcmask 523264  }
   0xd   : > { %v548_v2 = vsel %vm546_vm0, 4294967295, %v1512_v1  ;;  %v1471_v5 = vld [vmem:[%s1883_s1] sm:$0xff]   ;;  %v1513_v6 = vmov 0.0   ;;  %s1893_s21 = smov (!%p1565_p4, %s1280_s21), 3135  ;;  %vm497_vm3 = vcmask 220160   ;;  %vm1116_vm4 = vcmask 519168  }
   0xe   : > { %v549_v3 = vsel %vm547_vm1, %v548_v2, 0  ;;  %308 = vst.msk [vmem:[#allocation2 + $0x10] sm:$0xff] %vm305_vm2, %v1513_v6  ;;  %306 = vst.msk [vmem:[#allocation2] sm:$0xff] %vm305_vm2, %v1513_v6  ;;  %s1281_s25 = sshll.u32 %s1893_s21, 2  ;;  %v1659_v49 = vld [vmem:[%s1884_s2] ss:$0 sm:$0xff] }
   0xf   : > { %v551_v4 = vand.u32 %v1470_v0, %v549_v3  ;;  %307 = vst.msk [vmem:[#allocation2 + $0x8] sm:$0xff] %vm305_vm2, %v1513_v6  ;;  %309 = vst.msk [vmem:[#allocation2 + $0x18] sm:$0xff] %vm305_vm2, %v1513_v6  ;;  %s1616_s28 = scalar_lea.vmem %s1882_s0, %s1281_s25  ;;  %v1666_v57 = vld [vmem:[%s1885_s3] ss:$0 sm:$0xff]  ;;  %s1697_s9 = scalar_lea.vmem %s1886_s4, %s1281_s25 }
  0x10   : > { %310 = vst.msk [vmem:[#allocation2 + $0x20] sm:$0xff] %vm305_vm2, %v1513_v6  ;;  %311 = vst.msk [vmem:[#allocation2 + $0x28] sm:$0xff] %vm305_vm2, %v1513_v6  ;;  %v1472_v7 = vld [vmem:[%s1616_s28] sm:$0xff]   ;;  %v1474_v9 = vld [vmem:[%s1616_s28 + $0x8] sm:$0xff]  }
  0x11   : > { %312 = vst.msk [vmem:[#allocation2 + $0x30] sm:$0xff] %vm305_vm2, %v1513_v6  ;;  %313 = vst.msk [vmem:[#allocation2 + $0x38] sm:$0xff] %vm305_vm2, %v1513_v6  ;;  %1404 = vmatprep.subr.bf16.mxu0 %v551_v4  ;;  %1440 = vmatprep.subr.bf16.mxu1 %v551_v4  ;;  %v1473_v8 = vld [vmem:[%s1616_s28 + $0x40] sm:$0xff]   ;;  %v1475_v10 = vld [vmem:[%s1616_s28 + $0x48] sm:$0xff]  }
  0x12   : > { %314 = vst.msk [vmem:[#allocation2 + $0x40] sm:$0xff] %vm305_vm2, %v1513_v6  ;;  %315 = vst.msk [vmem:[#allocation2 + $0x48] sm:$0xff] %vm305_vm2, %v1513_v6  ;;  %1405 = vmatpush3.bf16.msra.mxu0 %v551_v4  ;;  %1442 = vmatpush3.bf16.msra.mxu1 %v551_v4  ;;  %v1476_v11 = vld [vmem:[%s1616_s28 + $0x10] sm:$0xff]   ;;  %v1478_v13 = vld [vmem:[%s1616_s28 + $0x18] sm:$0xff]  }
  0x13   : > { %316 = vst.msk [vmem:[#allocation2 + $0x50] sm:$0xff] %vm305_vm2, %v1513_v6  ;;  %317 = vst.msk [vmem:[#allocation2 + $0x58] sm:$0xff] %vm305_vm2, %v1513_v6  ;;  %1406 = vmatprep.subr.bf16.mxu0 %v1471_v5  ;;  %1441 = vmatprep.subr.bf16.mxu1 %v1471_v5  ;;  %v1477_v12 = vld [vmem:[%s1616_s28 + $0x50] sm:$0xff]   ;;  %v1479_v14 = vld [vmem:[%s1616_s28 + $0x58] sm:$0xff]  }
  0x14   : > { %318 = vst.msk [vmem:[#allocation2 + $0x60] sm:$0xff] %vm305_vm2, %v1513_v6  ;;  %319 = vst.msk [vmem:[#allocation2 + $0x68] sm:$0xff] %vm305_vm2, %v1513_v6  ;;  %1408 = vmatprep.mubr.msk.bf16.mxu0 %vm497_vm3, %v1472_v7  ;;  %1424 = vmatprep.mubr.msk.bf16.mxu1 %vm497_vm3, %v1473_v8  ;;  %v1480_v15 = vld [vmem:[%s1616_s28 + $0x20] sm:$0xff]   ;;  %v1482_v17 = vld [vmem:[%s1616_s28 + $0x28] sm:$0xff]  }
  0x15   : > { %320 = vst.msk [vmem:[#allocation2 + $0x70] sm:$0xff] %vm305_vm2, %v1513_v6  ;;  %321 = vst.msk [vmem:[#allocation2 + $0x78] sm:$0xff] %vm305_vm2, %v1513_v6  ;;  %v1481_v16 = vld [vmem:[%s1616_s28 + $0x60] sm:$0xff]   ;;  %v1483_v18 = vld [vmem:[%s1616_s28 + $0x68] sm:$0xff]  }
  0x16   : > { %322 = vst.msk [vmem:[#allocation2 + $0x80] sm:$0xff] %vm305_vm2, %v1513_v6  ;;  %323 = vst.msk [vmem:[#allocation2 + $0x88] sm:$0xff] %vm305_vm2, %v1513_v6  ;;  %1407 = vmatpush3.bf16.msra.mxu0 %v1471_v5  ;;  %1443 = vmatpush3.bf16.msra.mxu1 %v1471_v5  ;;  %v1484_v19 = vld [vmem:[%s1616_s28 + $0x30] sm:$0xff]   ;;  %v1486_v21 = vld [vmem:[%s1616_s28 + $0x38] sm:$0xff]  }
  0x17   : > { %324 = vst.msk [vmem:[#allocation2 + $0x90] sm:$0xff] %vm305_vm2, %v1513_v6  ;;  %325 = vst.msk [vmem:[#allocation2 + $0x98] sm:$0xff] %vm305_vm2, %v1513_v6  ;;  %v1485_v20 = vld [vmem:[%s1616_s28 + $0x70] sm:$0xff]   ;;  %v1487_v22 = vld [vmem:[%s1616_s28 + $0x78] sm:$0xff]  }
  0x18   : > { %326 = vst.msk [vmem:[#allocation2 + $0xa0] sm:$0xff] %vm305_vm2, %v1513_v6  ;;  %327 = vst.msk [vmem:[#allocation2 + $0xa8] sm:$0xff] %vm305_vm2, %v1513_v6  ;;  %v340_v23 = vld [vmem:[#allocation2 + $0x10] sm:$0xff]  ;;  %v338_v27 = vld [vmem:[#allocation2] sm:$0xff] }
  0x19   : > { %328 = vst.msk [vmem:[#allocation2 + $0xb0] sm:$0xff] %vm305_vm2, %v1513_v6  ;;  %329 = vst.msk [vmem:[#allocation2 + $0xb8] sm:$0xff] %vm305_vm2, %v1513_v6  ;;  %1409 = vmatmul.mubr.msk.bf16.vlgmr.msra.gmra.mxu0 %vm497_vm3, %v1474_v9  ;;  %1425 = vmatmul.mubr.msk.bf16.vlgmr.msra.gmra.mxu1 %vm497_vm3, %v1475_v10  ;;  %v341_v33 = vld [vmem:[#allocation2 + $0x18] sm:$0xff]  ;;  %v339_v39 = vld [vmem:[#allocation2 + $0x8] sm:$0xff] }
  0x1a   : > { %330 = vst.msk [vmem:[#allocation2 + $0xc0] sm:$0xff] %vm305_vm2, %v1513_v6  ;;  %331 = vst.msk [vmem:[#allocation2 + $0xc8] sm:$0xff] %vm305_vm2, %v1513_v6  ;;  %1412 = vmatprep.mubr.msk.bf16.mxu0 %vm497_vm3, %v1476_v11  ;;  %1428 = vmatprep.mubr.msk.bf16.mxu1 %vm497_vm3, %v1477_v12  ;;  %v344_v45 = vld [vmem:[#allocation2 + $0x30] sm:$0xff]  ;;  %v342_v52 = vld [vmem:[#allocation2 + $0x20] sm:$0xff] }
  0x1b   : > { %332 = vst.msk [vmem:[#allocation2 + $0xd0] sm:$0xff] %vm305_vm2, %v1513_v6  ;;  %333 = vst.msk [vmem:[#allocation2 + $0xd8] sm:$0xff] %vm305_vm2, %v1513_v6  ;;  %v345_v1 = vld [vmem:[#allocation2 + $0x38] sm:$0xff] }
  0x1c   : > { %334 = vst.msk [vmem:[#allocation2 + $0xe0] sm:$0xff] %vm305_vm2, %v1513_v6  ;;  %335 = vst.msk [vmem:[#allocation2 + $0xe8] sm:$0xff] %vm305_vm2, %v1513_v6 }
  0x1d   : > { %336 = vst.msk [vmem:[#allocation2 + $0xf0] sm:$0xff] %vm305_vm2, %v1513_v6  ;;  %337 = vst.msk [vmem:[#allocation2 + $0xf8] sm:$0xff] %vm305_vm2, %v1513_v6  ;;  %v354_v28 = vld [vmem:[#allocation2 + $0x80] sm:$0xff]  ;;  %v355_v40 = vld [vmem:[#allocation2 + $0x88] sm:$0xff] }
  0x1e   : > { %v356_v24 = vld [vmem:[#allocation2 + $0x90] sm:$0xff]  ;;  %v357_v34 = vld [vmem:[#allocation2 + $0x98] sm:$0xff] }
  0x1f   : > { %v358_v53 = vld [vmem:[#allocation2 + $0xa0] sm:$0xff] }
  0x20   : > { %v360_v46 = vld [vmem:[#allocation2 + $0xb0] sm:$0xff]  ;;  %v361_v2 = vld [vmem:[#allocation2 + $0xb8] sm:$0xff] }
  0x21   : > { %1413 = vmatmul.mubr.msk.bf16.gmra.mxu0 %vm497_vm3, %v1478_v13  ;;  %1429 = vmatmul.mubr.msk.bf16.gmra.mxu1 %vm497_vm3, %v1479_v14 }
  0x22   : > { %1416 = vmatprep.mubr.msk.bf16.mxu0 %vm497_vm3, %v1480_v15  ;;  %1432 = vmatprep.mubr.msk.bf16.mxu1 %vm497_vm3, %v1481_v16 }
  0x29   : > { %1417 = vmatmul.mubr.msk.bf16.gmra.mxu0 %vm497_vm3, %v1482_v17  ;;  %1433 = vmatmul.mubr.msk.bf16.gmra.mxu1 %vm497_vm3, %v1483_v18 }
  0x2a   : > { %1420 = vmatprep.mubr.msk.bf16.mxu0 %vm497_vm3, %v1484_v19  ;;  %1436 = vmatprep.mubr.msk.bf16.mxu1 %vm497_vm3, %v1485_v20 }
  0x31   : > { %1421 = vmatmul.mubr.msk.bf16.gmra.mxu0 %vm497_vm3, %v1486_v21  ;;  %1437 = vmatmul.mubr.msk.bf16.gmra.mxu1 %vm497_vm3, %v1487_v22 }
  0xd9   : > { %v1410_v25 = vpop.f32.mrf.mxu0  ;;  %v1426_v26 = vpop.f32.mrf.mxu1 }
  0xda   : > { %v716_v29 = vadd.f32 %v1410_v25, %v340_v23  ;;  %v732_v30 = vadd.f32 %v1426_v26, %v356_v24 }
  0xdb   : > { %v587_v31 = vpop.f32.mrf.mxu0  ;;  %v651_v32 = vpop.f32.mrf.mxu1 }
  0xdc   : > { %749 = vst.msk [vmem:[#allocation2 + $0x10] sm:$0xff] %vm305_vm2, %v716_v29  ;;  %765 = vst.msk [vmem:[#allocation2 + $0x90] sm:$0xff] %vm305_vm2, %v732_v30  ;;  %v714_v35 = vadd.f32 %v587_v31, %v338_v27  ;;  %v730_v36 = vadd.f32 %v651_v32, %v354_v28 }
  0xdd   : > { %v1411_v37 = vpop.f32.mrf.mxu0  ;;  %v1427_v38 = vpop.f32.mrf.mxu1 }
  0xde   : > { %747 = vst.msk [vmem:[#allocation2] sm:$0xff] %vm305_vm2, %v714_v35  ;;  %763 = vst.msk [vmem:[#allocation2 + $0x80] sm:$0xff] %vm305_vm2, %v730_v36  ;;  %v717_v41 = vadd.f32 %v1411_v37, %v341_v33  ;;  %v733_v42 = vadd.f32 %v1427_v38, %v357_v34 }
  0xdf   : > { %v590_v43 = vpop.f32.mrf.mxu0  ;;  %v654_v44 = vpop.f32.mrf.mxu1 }
  0xe0   : > { %750 = vst.msk [vmem:[#allocation2 + $0x18] sm:$0xff] %vm305_vm2, %v717_v41  ;;  %766 = vst.msk [vmem:[#allocation2 + $0x98] sm:$0xff] %vm305_vm2, %v733_v42  ;;  %v715_v47 = vadd.f32 %v590_v43, %v339_v39  ;;  %v731_v48 = vadd.f32 %v654_v44, %v355_v40 }
  0xe1   : > { %v1414_v50 = vpop.f32.mrf.mxu0  ;;  %v1430_v51 = vpop.f32.mrf.mxu1 }
  0xe2   : > { %748 = vst.msk [vmem:[#allocation2 + $0x8] sm:$0xff] %vm305_vm2, %v715_v47  ;;  %764 = vst.msk [vmem:[#allocation2 + $0x88] sm:$0xff] %vm305_vm2, %v731_v48  ;;  %v720_v54 = vadd.f32 %v1414_v50, %v344_v45  ;;  %v736_v55 = vadd.f32 %v1430_v51, %v360_v46 }
  0xe3   : > { %v784_v56 = vld [vmem:[#allocation2 + $0x10] sm:$0xff]  ;;  %v603_v59 = vpop.f32.mrf.mxu0  ;;  %v667_v60 = vpop.f32.mrf.mxu1 }
  0xe4   : > { %v800_v58 = vld [vmem:[#allocation2 + $0x90] sm:$0xff]  ;;  %v823_v61 = vmul.f32 %v1659_v49, %v784_v56  ;;  %753 = vst.msk [vmem:[#allocation2 + $0x30] sm:$0xff] %vm305_vm2, %v720_v54  ;;  %769 = vst.msk [vmem:[#allocation2 + $0xb0] sm:$0xff] %vm305_vm2, %v736_v55  ;;  %v718_v63 = vadd.f32 %v603_v59, %v342_v52  ;;  %v734_v0 = vadd.f32 %v667_v60, %v358_v53 }
  0xe5   : > { %v839_v62 = vmul.f32 %v1659_v49, %v800_v58  ;;  %v782_v3 = vld [vmem:[#allocation2] sm:$0xff]  ;;  %v1415_v5 = vpop.f32.mrf.mxu0  ;;  %v1431_v6 = vpop.f32.mrf.mxu1 }
  0xe6   : > { %v798_v4 = vld [vmem:[#allocation2 + $0x80] sm:$0xff]  ;;  %v862_v7 = vadd.f32 %v1666_v57, %v823_v61  ;;  %v821_v9 = vmul.f32 %v1659_v49, %v782_v3  ;;  %751 = vst.msk [vmem:[#allocation2 + $0x20] sm:$0xff] %vm305_vm2, %v718_v63  ;;  %767 = vst.msk [vmem:[#allocation2 + $0xa0] sm:$0xff] %vm305_vm2, %v734_v0  ;;  %v721_v13 = vadd.f32 %v1415_v5, %v345_v1 }
  0xe7   : > { %v878_v8 = vadd.f32 %v1666_v57, %v839_v62  ;;  %v837_v10 = vmul.f32 %v1659_v49, %v798_v4  ;;  %v785_v11 = vld [vmem:[#allocation2 + $0x18] sm:$0xff]  ;;  %v737_v14 = vadd.f32 %v1431_v6, %v361_v2  ;;  %v1678_v15 = vpop.f32.mrf.mxu0  ;;  %v1680_v16 = vpop.f32.mrf.mxu1 }
  0xe8   : > { %v801_v12 = vld [vmem:[#allocation2 + $0x98] sm:$0xff]  ;;  %vm894_vm5 = vcmp.gt.f32.partialorder %v862_v7, 0.0  ;;  %v926_v17 = vmul.f32 0.1, %v862_v7  ;;  %v860_v19 = vadd.f32 %v1666_v57, %v821_v9  ;;  %v824_v21 = vmul.f32 %v1659_v49, %v785_v11  ;;  %754 = vst.msk [vmem:[#allocation2 + $0x38] sm:$0xff] %vm305_vm2, %v721_v13  ;;  %v343_v9 = vld [vmem:[#allocation2 + $0x28] sm:$0xff] }
  0xe9   : > { %vm910_vm6 = vcmp.gt.f32.partialorder %v878_v8, 0.0  ;;  %v942_v18 = vmul.f32 0.1, %v878_v8  ;;  %v876_v20 = vadd.f32 %v1666_v57, %v837_v10  ;;  %v840_v22 = vmul.f32 %v1659_v49, %v801_v12  ;;  %v783_v23 = vld [vmem:[#allocation2 + $0x8] sm:$0xff]  ;;  %770 = vst.msk [vmem:[#allocation2 + $0xb8] sm:$0xff] %vm305_vm2, %v737_v14  ;;  %v1688_v25 = vpop.f32.mrf.mxu0  ;;  %v1690_v26 = vpop.f32.mrf.mxu1 }
  0xea   : > { %v799_v24 = vld [vmem:[#allocation2 + $0x88] sm:$0xff]  ;;  %v958_v27 = vsel %vm894_vm5, %v862_v7, %v926_v17  ;;  %v822_v29 = vmul.f32 %v1659_v49, %v783_v23  ;;  %vm892_vm7 = vcmp.gt.f32.partialorder %v860_v19, 0.0  ;;  %v924_v33 = vmul.f32 0.1, %v860_v19 }
  0xeb   : > { %v974_v28 = vsel %vm910_vm6, %v878_v8, %v942_v18  ;;  %v838_v30 = vmul.f32 %v1659_v49, %v799_v24  ;;  %v1356_v31 = vpack.c.bf16 %v958_v27, %v958_v27  ;;  %v788_v34 = vld [vmem:[#allocation2 + $0x30] sm:$0xff]  ;;  %v1701_v35 = vpop.f32.mrf.mxu0  ;;  %v1703_v36 = vpop.f32.mrf.mxu1  ;;  %vm908_vm8 = vcmp.gt.f32.partialorder %v876_v20, 0.0  ;;  %v359_v10 = vld [vmem:[#allocation2 + $0xa8] sm:$0xff] }
  0xec   : > { %v1372_v32 = vpack.c.bf16 %v974_v28, %v974_v28  ;;  %v940_v37 = vmul.f32 0.1, %v876_v20  ;;  %v863_v38 = vadd.f32 %v1666_v57, %v824_v21  ;;  %v879_v39 = vadd.f32 %v1666_v57, %v840_v22  ;;  %v804_v50 = vld [vmem:[#allocation2 + $0xb0] sm:$0xff]  ;;  %v346_v28 = vld [vmem:[#allocation2 + $0x40] sm:$0xff] }
  0xed   : > { %1119 = vst.msk [vmem:[%s1697_s9 + $0x8] sm:$0xf] %vm1116_vm4, %v1356_v31  ;;  %v956_v40 = vsel %vm892_vm7, %v860_v19, %v924_v33  ;;  %v861_v41 = vadd.f32 %v1666_v57, %v822_v29  ;;  %v877_v42 = vadd.f32 %v1666_v57, %v838_v30  ;;  %v827_v43 = vmul.f32 %v1659_v49, %v788_v34  ;;  %v1714_v44 = vpop.f32.mrf.mxu0  ;;  %v1716_v45 = vpop.f32.mrf.mxu1  ;;  %v786_v53 = vld [vmem:[#allocation2 + $0x20] sm:$0xff]  ;;  %v348_v24 = vld [vmem:[#allocation2 + $0x50] sm:$0xff] }
  0xee   : > { %1135 = vst.msk [vmem:[%s1697_s9 + $0x48] sm:$0xf] %vm1116_vm4, %v1372_v32  ;;  %v1354_v46 = vpack.c.bf16 %v956_v40, %v956_v40  ;;  %v972_v47 = vsel %vm908_vm8, %v876_v20, %v940_v37  ;;  %vm895_vm9 = vcmp.gt.f32.partialorder %v863_v38, 0.0  ;;  %v927_v48 = vmul.f32 0.1, %v863_v38  ;;  %v802_v0 = vld [vmem:[#allocation2 + $0xa0] sm:$0xff] }
  0xef   : > { %v1370_v51 = vpack.c.bf16 %v972_v47, %v972_v47  ;;  %vm911_vm10 = vcmp.gt.f32.partialorder %v879_v39, 0.0  ;;  %v943_v52 = vmul.f32 0.1, %v879_v39  ;;  %vm893_vm11 = vcmp.gt.f32.partialorder %v861_v41, 0.0  ;;  %v1718_v54 = vpop.f32.mrf.mxu0  ;;  %v1720_v55 = vpop.f32.mrf.mxu1  ;;  %v789_v1 = vld [vmem:[#allocation2 + $0x38] sm:$0xff]  ;;  %v364_v27 = vld [vmem:[#allocation2 + $0xd0] sm:$0xff] }
  0xf0   : > { %1117 = vst.msk [vmem:[%s1697_s9] sm:$0xf] %vm1116_vm4, %v1354_v46  ;;  %v959_v56 = vsel %vm895_vm9, %v863_v38, %v927_v48  ;;  %v925_v58 = vmul.f32 0.1, %v861_v41  ;;  %vm909_vm12 = vcmp.gt.f32.partialorder %v877_v42, 0.0  ;;  %v866_v62 = vadd.f32 %v1666_v57, %v827_v43  ;;  %v805_v8 = vld [vmem:[#allocation2 + $0xb8] sm:$0xff] }
  0xf1   : > { %v941_v59 = vmul.f32 0.1, %v877_v42  ;;  %1133 = vst.msk [vmem:[%s1697_s9 + $0x40] sm:$0xf] %vm1116_vm4, %v1370_v51  ;;  %v1357_v60 = vpack.c.bf16 %v959_v56, %v959_v56  ;;  %v975_v61 = vsel %vm911_vm10, %v879_v39, %v943_v52  ;;  %v843_v63 = vmul.f32 %v1659_v49, %v804_v50  ;;  %v1728_v2 = vpop.f32.mrf.mxu0  ;;  %v1730_v3 = vpop.f32.mrf.mxu1  ;;  %v365_v48 = vld [vmem:[#allocation2 + $0xd8] sm:$0xff]  ;;  %v347_v50 = vld [vmem:[#allocation2 + $0x48] sm:$0xff] }
  0xf2   : > { %v1373_v4 = vpack.c.bf16 %v975_v61, %v975_v61  ;;  %v957_v5 = vsel %vm893_vm11, %v861_v41, %v925_v58  ;;  %v825_v7 = vmul.f32 %v1659_v49, %v786_v53  ;;  %vm898_vm13 = vcmp.gt.f32.partialorder %v866_v62, 0.0  ;;  %v362_v41 = vld [vmem:[#allocation2 + $0xc0] sm:$0xff]  ;;  %v368_v61 = vld [vmem:[#allocation2 + $0xf0] sm:$0xff] }
  0xf3   : > { %v973_v6 = vsel %vm909_vm12, %v877_v42, %v941_v59  ;;  %1120 = vst.msk [vmem:[%s1697_s9 + $0xc] sm:$0xf] %vm1116_vm4, %v1357_v60  ;;  %v1355_v11 = vpack.c.bf16 %v957_v5, %v957_v5  ;;  %v930_v13 = vmul.f32 0.1, %v866_v62  ;;  %v882_v14 = vadd.f32 %v1666_v57, %v843_v63  ;;  %v1749_v29 = vpop.f32.mrf.mxu0  ;;  %v1751_v30 = vpop.f32.mrf.mxu1  ;;  %v349_v42 = vld [vmem:[#allocation2 + $0x58] sm:$0xff]  ;;  %v366_v63 = vld [vmem:[#allocation2 + $0xe0] sm:$0xff] }
  0xf4   : > { %v1371_v12 = vpack.c.bf16 %v973_v6, %v973_v6  ;;  %1136 = vst.msk [vmem:[%s1697_s9 + $0x4c] sm:$0xf] %vm1116_vm4, %v1373_v4  ;;  %v864_v17 = vadd.f32 %v1666_v57, %v825_v7  ;;  %v841_v18 = vmul.f32 %v1659_v49, %v802_v0  ;;  %v828_v19 = vmul.f32 %v1659_v49, %v789_v1  ;;  %v353_v6 = vld [vmem:[#allocation2 + $0x78] sm:$0xff] }
  0xf5   : > { %1118 = vst.msk [vmem:[%s1697_s9 + $0x4] sm:$0xf] %vm1116_vm4, %v1355_v11  ;;  %v962_v20 = vsel %vm898_vm13, %v866_v62, %v930_v13  ;;  %v844_v21 = vmul.f32 %v1659_v49, %v805_v8  ;;  %v719_v22 = vadd.f32 %v1678_v15, %v343_v9  ;;  %v735_v23 = vadd.f32 %v1680_v16, %v359_v10  ;;  %v1423_v51 = vpop.f32.mrf.mxu0  ;;  %v1439_v52 = vpop.f32.mrf.mxu1  ;;  %v350_v62 = vld [vmem:[#allocation2 + $0x60] sm:$0xff]  ;;  %v369_v7 = vld [vmem:[#allocation2 + $0xf8] sm:$0xff]  ;;  %v351_v10 = vld [vmem:[#allocation2 + $0x68] sm:$0xff] }
  0xf6   : > { %1134 = vst.msk [vmem:[%s1697_s9 + $0x44] sm:$0xf] %vm1116_vm4, %v1371_v12  ;;  %v1360_v31 = vpack.c.bf16 %v962_v20, %v962_v20  ;;  %vm914_vm14 = vcmp.gt.f32.partialorder %v882_v14, 0.0  ;;  %v946_v32 = vmul.f32 0.1, %v882_v14  ;;  %vm896_vm15 = vcmp.gt.f32.partialorder %v864_v17, 0.0 }
  0xf7   : > { %v928_v33 = vmul.f32 0.1, %v864_v17  ;;  %v880_v34 = vadd.f32 %v1666_v57, %v841_v18  ;;  %v867_v37 = vadd.f32 %v1666_v57, %v828_v19  ;;  %v883_v15 = vadd.f32 %v1666_v57, %v844_v21  ;;  %752 = vst.msk [vmem:[#allocation2 + $0x28] sm:$0xff] %vm305_vm2, %v719_v22  ;;  %768 = vst.msk [vmem:[#allocation2 + $0xa8] sm:$0xff] %vm305_vm2, %v735_v23  ;;  %v638_v11 = vpop.f32.mrf.mxu0  ;;  %v367_v12 = vld [vmem:[#allocation2 + $0xe8] sm:$0xff] }
  0xf8   : > { %1123 = vst.msk [vmem:[%s1697_s9 + $0x18] sm:$0xf] %vm1116_vm4, %v1360_v31  ;;  %v978_v16 = vsel %vm914_vm14, %v882_v14, %v946_v32  ;;  %v724_v38 = vadd.f32 %v1688_v25, %v348_v24  ;;  %v740_v39 = vadd.f32 %v1690_v26, %v364_v27  ;;  %v722_v40 = vadd.f32 %v1701_v35, %v346_v28  ;;  %v363_v25 = vld [vmem:[#allocation2 + $0xc8] sm:$0xff]  ;;  %v352_v26 = vld [vmem:[#allocation2 + $0x70] sm:$0xff] }
  0xf9   : > { %v1376_v43 = vpack.c.bf16 %v978_v16, %v978_v16  ;;  %v960_v46 = vsel %vm896_vm15, %v864_v17, %v928_v33  ;;  %vm912_vm0 = vcmp.gt.f32.partialorder %v880_v34, 0.0  ;;  %v944_v47 = vmul.f32 0.1, %v880_v34 }
  0xfa   : > { %v1358_v53 = vpack.c.bf16 %v960_v46, %v960_v46  ;;  %vm899_vm1 = vcmp.gt.f32.partialorder %v867_v37, 0.0  ;;  %v931_v56 = vmul.f32 0.1, %v867_v37  ;;  %vm915_vm3 = vcmp.gt.f32.partialorder %v883_v15, 0.0  ;;  %757 = vst.msk [vmem:[#allocation2 + $0x50] sm:$0xff] %vm305_vm2, %v724_v38  ;;  %773 = vst.msk [vmem:[#allocation2 + $0xd0] sm:$0xff] %vm305_vm2, %v740_v39 }
  0xfb   : > { %755 = vst.msk [vmem:[#allocation2 + $0x40] sm:$0xff] %vm305_vm2, %v722_v40  ;;  %v976_v35 = vsel %vm912_vm0, %v880_v34, %v944_v47  ;;  %v947_v58 = vmul.f32 0.1, %v883_v15  ;;  %v738_v59 = vadd.f32 %v1703_v36, %v362_v41  ;;  %v725_v60 = vadd.f32 %v1714_v44, %v349_v42 }
  0xfc   : > { %1139 = vst.msk [vmem:[%s1697_s9 + $0x58] sm:$0xf] %vm1116_vm4, %v1376_v43  ;;  %1121 = vst.msk [vmem:[%s1697_s9 + $0x10] sm:$0xf] %vm1116_vm4, %v1358_v53  ;;  %v1374_v0 = vpack.c.bf16 %v976_v35, %v976_v35  ;;  %v963_v1 = vsel %vm899_vm1, %v867_v37, %v931_v56  ;;  %v741_v4 = vadd.f32 %v1716_v45, %v365_v48  ;;  %v702_v45 = vpop.f32.mrf.mxu1 }
  0xfd   : > { %v723_v5 = vadd.f32 %v1718_v54, %v347_v50  ;;  %v1361_v8 = vpack.c.bf16 %v963_v1, %v963_v1  ;;  %v979_v36 = vsel %vm915_vm3, %v883_v15, %v947_v58  ;;  %771 = vst.msk [vmem:[#allocation2 + $0xc0] sm:$0xff] %vm305_vm2, %v738_v59  ;;  %758 = vst.msk [vmem:[#allocation2 + $0x58] sm:$0xff] %vm305_vm2, %v725_v60 }
  0xfe   : > { %v739_v44 = vadd.f32 %v1720_v55, %v363_v25  ;;  %v728_v9 = vadd.f32 %v1728_v2, %v352_v26  ;;  %1137 = vst.msk [vmem:[%s1697_s9 + $0x50] sm:$0xf] %vm1116_vm4, %v1374_v0  ;;  %v1377_v54 = vpack.c.bf16 %v979_v36, %v979_v36  ;;  %v787_v13 = vld [vmem:[#allocation2 + $0x28] sm:$0xff]  ;;  %v744_v17 = vadd.f32 %v1730_v3, %v368_v61 }
  0xff   : > { %v803_v14 = vld [vmem:[#allocation2 + $0xa8] sm:$0xff]  ;;  %774 = vst.msk [vmem:[#allocation2 + $0xd8] sm:$0xff] %vm305_vm2, %v741_v4  ;;  %756 = vst.msk [vmem:[#allocation2 + $0x48] sm:$0xff] %vm305_vm2, %v723_v5  ;;  %v726_v55 = vadd.f32 %v1749_v29, %v350_v62  ;;  %v742_v2 = vadd.f32 %v1751_v30, %v366_v63  ;;  %v826_v18 = vmul.f32 %v1659_v49, %v787_v13 }
 0x100   : > { %1124 = vst.msk [vmem:[%s1697_s9 + $0x1c] sm:$0xf] %vm1116_vm4, %v1361_v8  ;;  %v842_v19 = vmul.f32 %v1659_v49, %v803_v14  ;;  %v729_v20 = vadd.f32 %v1423_v51, %v353_v6  ;;  %v745_v21 = vadd.f32 %v1439_v52, %v369_v7  ;;  %1140 = vst.msk [vmem:[%s1697_s9 + $0x5c] sm:$0xf] %vm1116_vm4, %v1377_v54 }
 0x101   : > { %772 = vst.msk [vmem:[#allocation2 + $0xc8] sm:$0xff] %vm305_vm2, %v739_v44  ;;  %761 = vst.msk [vmem:[#allocation2 + $0x70] sm:$0xff] %vm305_vm2, %v728_v9  ;;  %v727_v3 = vadd.f32 %v638_v11, %v351_v10  ;;  %v743_v22 = vadd.f32 %v702_v45, %v367_v12  ;;  %v865_v23 = vadd.f32 %v1666_v57, %v826_v18  ;;  %v792_v27 = vld [vmem:[#allocation2 + $0x50] sm:$0xff] }
 0x102   : > { %777 = vst.msk [vmem:[#allocation2 + $0xf0] sm:$0xff] %vm305_vm2, %v744_v17  ;;  %759 = vst.msk [vmem:[#allocation2 + $0x60] sm:$0xff] %vm305_vm2, %v726_v55  ;;  %v881_v24 = vadd.f32 %v1666_v57, %v842_v19  ;;  %v808_v28 = vld [vmem:[#allocation2 + $0xd0] sm:$0xff]  ;;  %v790_v29 = vld [vmem:[#allocation2 + $0x40] sm:$0xff]  ;;  %v831_v30 = vmul.f32 %v1659_v49, %v792_v27 }
 0x103   : > { %775 = vst.msk [vmem:[#allocation2 + $0xe0] sm:$0xff] %vm305_vm2, %v742_v2  ;;  %762 = vst.msk [vmem:[#allocation2 + $0x78] sm:$0xff] %vm305_vm2, %v729_v20  ;;  %v847_v31 = vmul.f32 %v1659_v49, %v808_v28  ;;  %v829_v32 = vmul.f32 %v1659_v49, %v790_v29  ;;  %vm897_vm5 = vcmp.gt.f32.partialorder %v865_v23, 0.0  ;;  %v929_v33 = vmul.f32 0.1, %v865_v23 }
 0x104   : > { %778 = vst.msk [vmem:[#allocation2 + $0xf8] sm:$0xff] %vm305_vm2, %v745_v21  ;;  %760 = vst.msk [vmem:[#allocation2 + $0x68] sm:$0xff] %vm305_vm2, %v727_v3  ;;  %vm913_vm6 = vcmp.gt.f32.partialorder %v881_v24, 0.0  ;;  %v945_v34 = vmul.f32 0.1, %v881_v24  ;;  %v870_v37 = vadd.f32 %v1666_v57, %v831_v30  ;;  %v806_v38 = vld [vmem:[#allocation2 + $0xc0] sm:$0xff] }
 0x105   : > { %776 = vst.msk [vmem:[#allocation2 + $0xe8] sm:$0xff] %vm305_vm2, %v743_v22  ;;  %v886_v15 = vadd.f32 %v1666_v57, %v847_v31  ;;  %v868_v16 = vadd.f32 %v1666_v57, %v829_v32  ;;  %v793_v39 = vld [vmem:[#allocation2 + $0x58] sm:$0xff]  ;;  %v961_v40 = vsel %vm897_vm5, %v865_v23, %v929_v33  ;;  %v845_v42 = vmul.f32 %v1659_v49, %v806_v38 }
 0x106   : > { %v977_v41 = vsel %vm913_vm6, %v881_v24, %v945_v34  ;;  %v832_v43 = vmul.f32 %v1659_v49, %v793_v39  ;;  %v809_v46 = vld [vmem:[#allocation2 + $0xd8] sm:$0xff]  ;;  %v1359_v47 = vpack.c.bf16 %v961_v40, %v961_v40  ;;  %vm902_vm2 = vcmp.gt.f32.partialorder %v870_v37, 0.0  ;;  %v791_v51 = vld [vmem:[#allocation2 + $0x48] sm:$0xff] }
 0x107   : > { %v1375_v48 = vpack.c.bf16 %v977_v41, %v977_v41  ;;  %v934_v50 = vmul.f32 0.1, %v870_v37  ;;  %vm918_vm7 = vcmp.gt.f32.partialorder %v886_v15, 0.0  ;;  %v950_v52 = vmul.f32 0.1, %v886_v15 }
 0x108   : > { %vm900_vm8 = vcmp.gt.f32.partialorder %v868_v16, 0.0  ;;  %v932_v53 = vmul.f32 0.1, %v868_v16  ;;  %1122 = vst.msk [vmem:[%s1697_s9 + $0x14] sm:$0xf] %vm1116_vm4, %v1359_v47  ;;  %v884_v25 = vadd.f32 %v1666_v57, %v845_v42  ;;  %v871_v26 = vadd.f32 %v1666_v57, %v832_v43  ;;  %v807_v62 = vld [vmem:[#allocation2 + $0xc8] sm:$0xff] }
 0x109   : > { %1138 = vst.msk [vmem:[%s1697_s9 + $0x54] sm:$0xf] %vm1116_vm4, %v1375_v48  ;;  %v966_v56 = vsel %vm902_vm2, %v870_v37, %v934_v50  ;;  %v848_v35 = vmul.f32 %v1659_v49, %v809_v46  ;;  %v982_v59 = vsel %vm918_vm7, %v886_v15, %v950_v52  ;;  %v830_v61 = vmul.f32 %v1659_v49, %v791_v51  ;;  %v796_v63 = vld [vmem:[#allocation2 + $0x70] sm:$0xff]  ;;  %v794_v11 = vld [vmem:[#allocation2 + $0x60] sm:$0xff] }
 0x10a   : > { %v1364_v58 = vpack.c.bf16 %v966_v56, %v966_v56  ;;  %v964_v60 = vsel %vm900_vm8, %v868_v16, %v932_v53  ;;  %v812_v0 = vld [vmem:[#allocation2 + $0xf0] sm:$0xff]  ;;  %v1380_v1 = vpack.c.bf16 %v982_v59, %v982_v59  ;;  %vm916_vm9 = vcmp.gt.f32.partialorder %v884_v25, 0.0  ;;  %v810_v20 = vld [vmem:[#allocation2 + $0xe0] sm:$0xff]  ;;  %v797_v23 = vld [vmem:[#allocation2 + $0x78] sm:$0xff] }
 0x10b   : > { %v1362_v4 = vpack.c.bf16 %v964_v60, %v964_v60  ;;  %v948_v5 = vmul.f32 0.1, %v884_v25  ;;  %vm903_vm10 = vcmp.gt.f32.partialorder %v871_v26, 0.0  ;;  %v935_v6 = vmul.f32 0.1, %v871_v26  ;;  %v813_v24 = vld [vmem:[#allocation2 + $0xf8] sm:$0xff] }
 0x10c   : > { %1127 = vst.msk [vmem:[%s1697_s9 + $0x28] sm:$0xf] %vm1116_vm4, %v1364_v58  ;;  %v887_v7 = vadd.f32 %v1666_v57, %v848_v35  ;;  %v869_v8 = vadd.f32 %v1666_v57, %v830_v61  ;;  %1143 = vst.msk [vmem:[%s1697_s9 + $0x68] sm:$0xf] %vm1116_vm4, %v1380_v1  ;;  %v846_v44 = vmul.f32 %v1659_v49, %v807_v62  ;;  %v795_v16 = vld [vmem:[#allocation2 + $0x68] sm:$0xff] }
 0x10d   : > { %1125 = vst.msk [vmem:[%s1697_s9 + $0x20] sm:$0xf] %vm1116_vm4, %v1362_v4  ;;  %v980_v36 = vsel %vm916_vm9, %v884_v25, %v948_v5  ;;  %v835_v9 = vmul.f32 %v1659_v49, %v796_v63  ;;  %v851_v10 = vmul.f32 %v1659_v49, %v812_v0  ;;  %v967_v45 = vsel %vm903_vm10, %v871_v26, %v935_v6  ;;  %v811_v38 = vld [vmem:[#allocation2 + $0xe8] sm:$0xff] }
 0x10e   : > { %v1378_v12 = vpack.c.bf16 %v980_v36, %v980_v36  ;;  %vm919_vm11 = vcmp.gt.f32.partialorder %v887_v7, 0.0  ;;  %v951_v54 = vmul.f32 0.1, %v887_v7  ;;  %v1365_v13 = vpack.c.bf16 %v967_v45, %v967_v45 }
 0x10f   : > { %vm901_vm12 = vcmp.gt.f32.partialorder %v869_v8, 0.0  ;;  %v933_v14 = vmul.f32 0.1, %v869_v8  ;;  %v885_v17 = vadd.f32 %v1666_v57, %v846_v44  ;;  %v874_v2 = vadd.f32 %v1666_v57, %v835_v9 }
 0x110   : > { %1141 = vst.msk [vmem:[%s1697_s9 + $0x60] sm:$0xf] %vm1116_vm4, %v1378_v12  ;;  %v983_v55 = vsel %vm919_vm11, %v887_v7, %v951_v54  ;;  %v890_v18 = vadd.f32 %v1666_v57, %v851_v10  ;;  %v833_v19 = vmul.f32 %v1659_v49, %v794_v11  ;;  %1128 = vst.msk [vmem:[%s1697_s9 + $0x2c] sm:$0xf] %vm1116_vm4, %v1365_v13 }
 0x111   : > { %v1381_v21 = vpack.c.bf16 %v983_v55, %v983_v55  ;;  %v965_v3 = vsel %vm901_vm12, %v869_v8, %v933_v14  ;;  %vm917_vm13 = vcmp.gt.f32.partialorder %v885_v17, 0.0  ;;  %v949_v22 = vmul.f32 0.1, %v885_v17 }
 0x112   : > { %v1363_v27 = vpack.c.bf16 %v965_v3, %v965_v3  ;;  %vm906_vm14 = vcmp.gt.f32.partialorder %v874_v2, 0.0  ;;  %v938_v28 = vmul.f32 0.1, %v874_v2  ;;  %vm922_vm15 = vcmp.gt.f32.partialorder %v890_v18, 0.0 }
 0x113   : > { %1144 = vst.msk [vmem:[%s1697_s9 + $0x6c] sm:$0xf] %vm1116_vm4, %v1381_v21  ;;  %v981_v29 = vsel %vm917_vm13, %v885_v17, %v949_v22  ;;  %v954_v30 = vmul.f32 0.1, %v890_v18  ;;  %v872_v31 = vadd.f32 %v1666_v57, %v833_v19  ;;  %v849_v32 = vmul.f32 %v1659_v49, %v810_v20 }
 0x114   : > { %1126 = vst.msk [vmem:[%s1697_s9 + $0x24] sm:$0xf] %vm1116_vm4, %v1363_v27  ;;  %v1379_v33 = vpack.c.bf16 %v981_v29, %v981_v29  ;;  %v970_v34 = vsel %vm906_vm14, %v874_v2, %v938_v28  ;;  %v836_v37 = vmul.f32 %v1659_v49, %v797_v23  ;;  %v852_v15 = vmul.f32 %v1659_v49, %v813_v24 }
 0x115   : > { %v1368_v39 = vpack.c.bf16 %v970_v34, %v970_v34  ;;  %v986_v40 = vsel %vm922_vm15, %v890_v18, %v954_v30  ;;  %vm904_vm0 = vcmp.gt.f32.partialorder %v872_v31, 0.0  ;;  %v936_v41 = vmul.f32 0.1, %v872_v31 }
 0x116   : > { %1142 = vst.msk [vmem:[%s1697_s9 + $0x64] sm:$0xf] %vm1116_vm4, %v1379_v33  ;;  %v1384_v42 = vpack.c.bf16 %v986_v40, %v986_v40  ;;  %v888_v43 = vadd.f32 %v1666_v57, %v849_v32  ;;  %v875_v46 = vadd.f32 %v1666_v57, %v836_v37  ;;  %v891_v47 = vadd.f32 %v1666_v57, %v852_v15 }
 0x117   : > { %1131 = vst.msk [vmem:[%s1697_s9 + $0x38] sm:$0xf] %vm1116_vm4, %v1368_v39  ;;  %v968_v48 = vsel %vm904_vm0, %v872_v31, %v936_v41  ;;  %v834_v50 = vmul.f32 %v1659_v49, %v795_v16  ;;  %v850_v51 = vmul.f32 %v1659_v49, %v811_v38 }
 0x118   : > { %1147 = vst.msk [vmem:[%s1697_s9 + $0x78] sm:$0xf] %vm1116_vm4, %v1384_v42  ;;  %v1366_v52 = vpack.c.bf16 %v968_v48, %v968_v48  ;;  %vm920_vm1 = vcmp.gt.f32.partialorder %v888_v43, 0.0  ;;  %v952_v53 = vmul.f32 0.1, %v888_v43  ;;  %vm907_vm3 = vcmp.gt.f32.partialorder %v875_v46, 0.0 }
 0x119   : > { %v939_v56 = vmul.f32 0.1, %v875_v46  ;;  %vm923_vm5 = vcmp.gt.f32.partialorder %v891_v47, 0.0  ;;  %v955_v25 = vmul.f32 0.1, %v891_v47  ;;  %v873_v26 = vadd.f32 %v1666_v57, %v834_v50 }
 0x11a   : > { %1129 = vst.msk [vmem:[%s1697_s9 + $0x30] sm:$0xf] %vm1116_vm4, %v1366_v52  ;;  %v984_v35 = vsel %vm920_vm1, %v888_v43, %v952_v53  ;;  %v889_v58 = vadd.f32 %v1666_v57, %v850_v51 }
 0x11b   : > { %v1382_v49 = vpack.c.bf16 %v984_v35, %v984_v35  ;;  %v971_v59 = vsel %vm907_vm3, %v875_v46, %v939_v56  ;;  %v987_v60 = vsel %vm923_vm5, %v891_v47, %v955_v25  ;;  %vm905_vm6 = vcmp.gt.f32.partialorder %v873_v26, 0.0 }
 0x11c   : > { %v1369_v61 = vpack.c.bf16 %v971_v59, %v971_v59  ;;  %v1385_v62 = vpack.c.bf16 %v987_v60, %v987_v60  ;;  %v937_v63 = vmul.f32 0.1, %v873_v26  ;;  %vm921_vm2 = vcmp.gt.f32.partialorder %v889_v58, 0.0 }
 0x11d   : > { %1145 = vst.msk [vmem:[%s1697_s9 + $0x70] sm:$0xf] %vm1116_vm4, %v1382_v49  ;;  %v953_v0 = vmul.f32 0.1, %v889_v58 }
 0x11e   : > { %1132 = vst.msk [vmem:[%s1697_s9 + $0x3c] sm:$0xf] %vm1116_vm4, %v1369_v61  ;;  %1148 = vst.msk [vmem:[%s1697_s9 + $0x7c] sm:$0xf] %vm1116_vm4, %v1385_v62  ;;  %v969_v1 = vsel %vm905_vm6, %v873_v26, %v937_v63 }
 0x11f   : > { %v1367_v4 = vpack.c.bf16 %v969_v1, %v969_v1  ;;  %v985_v57 = vsel %vm921_vm2, %v889_v58, %v953_v0 }
 0x120   : > { %v1383_v5 = vpack.c.bf16 %v985_v57, %v985_v57 }
 0x121   : > { %1130 = vst.msk [vmem:[%s1697_s9 + $0x34] sm:$0xf] %vm1116_vm4, %v1367_v4 }
 0x122   : > { %1146 = vst.msk [vmem:[%s1697_s9 + $0x74] sm:$0xf] %vm1116_vm4, %v1383_v5 }
 0x123 PF: > { %s14_s17 = sadd.s32 1, %s1510_s17   ;;  %s1888_s15 = smov %s1506_s16 }
 0x124   : > { %p11_p5 = scmp.ge.s32.totalorder %s14_s17, 100   ;;  %s1889_s16 = smov %s1891_s18 }
 0x126   :  { %13 = sbr.rel (!%p11_p5) target bundleno = 2 (0x2), region = 83 }

</bundles_post_ra>
